<compile_context>
chip_gen: v7x
topology: tpu7x:2x2x1
jax: 0.10.0
libtpu: 0.0.40
codegen_flags: <defaults>
</compile_context>

<pallas_src>
import jax
import jax.numpy as jnp
from jax.experimental import pallas as pl
from jax.experimental.pallas import tpu as pltpu

IN_FEATURES = 3
HIDDEN = 16

MAX_BATCH_TILE = 8192           # rows per grid step; ~16 MiB double-buffered VMEM
MIN_GRID_STEPS = 2              # keep >=2 "parallel" steps for v7x's two cores
_VMEM_LIMIT_BYTES = 32 * 1024 * 1024


def _round_up(v, m):
    return (v + m - 1) // m * m


def _linear_relu_kernel(x_ref, w_ref, b_ref, o_ref):
    # x_ref: (TB, 3)  w_ref: (3, 16)  b_ref: (1, 16)  o_ref: (TB, 16)
    # Tiny contraction (K=3, N=16): do it on the VPU as 3 broadcast
    # multiply-adds instead of pushing a <0.1%-utilized tile through the MXU.
    x = x_ref[...]
    w = w_ref[...]
    y = b_ref[...] + x[:, 0:1] * w[0:1, :]         # (1,16) + (TB,1)*(1,16) -> (TB,16)
    for k in range(1, x.shape[1]):                 # unrolled at trace time (K=3)
        y = y + x[:, k:k + 1] * w[k:k + 1, :]
    o_ref[...] = jnp.maximum(y, 0.0).astype(o_ref.dtype)


def _choose_batch_tile(B):
    """Pick rows-per-grid-step TB (static, shape-dependent only)."""
    # Small batches: a single full-array block (exempt from the (8,128) rule),
    # grid=1, zero padding and zero wrapper copies.
    if B <= 8 * MIN_GRID_STEPS:
        return B
    # Otherwise: as large as the VMEM budget allows, but keep >= MIN_GRID_STEPS
    # grid steps so the "parallel" axis can shard across v7x's two TensorCores.
    tb = min(MAX_BATCH_TILE, pl.cdiv(B, MIN_GRID_STEPS))
    return _round_up(tb, 8)


@jax.jit
def simplenet_forward(x, w_t, b):
    """x: (B, 3) f32, w_t: (3, 16) f32 (pre-transposed), b: (1, 16) f32 -> (B, 16)."""
    B, K = x.shape
    N = w_t.shape[1]
    TB = _choose_batch_tile(B)

    return pl.pallas_call(
        _linear_relu_kernel,
        out_shape=jax.ShapeDtypeStruct((B, N), jnp.float32),
        grid_spec=pltpu.PrefetchScalarGridSpec(
            num_scalar_prefetch=0,
            grid=(pl.cdiv(B, TB),),                        # ragged last tile OK
            in_specs=[
                pl.BlockSpec((TB, K), lambda i: (i, 0)),   # x tile over batch
                pl.BlockSpec((K, N), lambda i: (0, 0)),    # full weight, resident
                pl.BlockSpec((1, N), lambda i: (0, 0)),    # full bias, resident
            ],
            out_specs=pl.BlockSpec((TB, N), lambda i: (i, 0)),
        ),
        compiler_params=pltpu.CompilerParams(
            dimension_semantics=("parallel",),
            vmem_limit_bytes=_VMEM_LIMIT_BYTES,
        ),
    )(x, w_t, b)


def init_params(key):
    """Deterministic PyTorch-style init for fc1 (and fc2, unused in forward)."""
    k1, k2, k3, k4 = jax.random.split(key, 4)
    bound1 = 1.0 / jnp.sqrt(3.0)
    w1 = jax.random.uniform(k1, (HIDDEN, IN_FEATURES), jnp.float32, -bound1, bound1)
    b1 = jax.random.uniform(k2, (HIDDEN,), jnp.float32, -bound1, bound1)
    bound2 = 1.0 / jnp.sqrt(16.0)
    # fc2 params mirror __init__ but are not used in forward().
    w2 = jax.random.uniform(k3, (8, HIDDEN), jnp.float32, -bound2, bound2)
    b2 = jax.random.uniform(k4, (8,), jnp.float32, -bound2, bound2)
    return w1, b1, w2, b2


def prepare_params(w1, b1):
    """One-time prep hoisted out of the hot path: W -> (K, N), b -> (1, N)."""
    return jnp.asarray(w1).T, jnp.asarray(b1).reshape(1, -1)


if __name__ == "__main__":
    key = jax.random.PRNGKey(0)
    k_x, k_p = jax.random.split(key)

    w1, b1, w2, b2 = init_params(k_p)
    w_t, b = prepare_params(w1, b1)       # executed once, outside the jitted forward

    # Primary small-shape run (single full-array tile path).
    batch = 2
    x = jax.random.normal(k_x, (batch, IN_FEATURES), jnp.float32)
    out = simplenet_forward(x, w_t, b)
    out = jax.block_until_ready(out)
    ref = jnp.maximum(x @ w1.T + b1, 0.0)
    assert out.shape == (batch, HIDDEN)
    assert jnp.allclose(out, ref, atol=1e-5, rtol=1e-5)

    # Also validate the multi-step ragged-tile path (no pad / no output slice).
    batch2 = 1000
    x2 = jax.random.normal(k_x, (batch2, IN_FEATURES), jnp.float32)
    out2 = jax.block_until_ready(simplenet_forward(x2, w_t, b))
    ref2 = jnp.maximum(x2 @ w1.T + b1, 0.0)
    assert out2.shape == (batch2, HIDDEN)
    assert jnp.allclose(out2, ref2, atol=1e-5, rtol=1e-5)

    print("KERNEL_OK")
</pallas_src>

<mosaic_0001>
module attributes {stable_mosaic.version = 11 : i64} {
  func.func @_linear_relu_kernel(%arg0: i32, %arg1: memref<2x3xf32, #tpu.memory_space<vmem>>, %arg2: memref<3x16xf32, #tpu.memory_space<vmem>>, %arg3: memref<1x16xf32, #tpu.memory_space<vmem>>, %arg4: memref<2x16xf32, #tpu.memory_space<vmem>>) attributes {dimension_semantics = [#tpu.dimension_semantics<parallel>], iteration_bounds = array<i64: 1>, scalar_prefetch = 0 : i64, scratch_operands = 0 : i64, tpu.core_type = #tpu.core_type<tc>, window_params = [{transform_indices = @transform_0, window_bounds = array<i64: 2, 3>}, {pipeline_mode = #tpu.pipeline_mode<synchronous>, transform_indices = @transform_1, window_bounds = array<i64: 3, 16>}, {pipeline_mode = #tpu.pipeline_mode<synchronous>, transform_indices = @transform_2, window_bounds = array<i64: 1, 16>}, {transform_indices = @transform_3, window_bounds = array<i64: 2, 16>}]} {
    %c0 = arith.constant 0 : index
    %c0_0 = arith.constant 0 : index
    %0 = vector.load %arg1[%c0, %c0_0] : memref<2x3xf32, #tpu.memory_space<vmem>>, vector<2x3xf32>
    %c0_1 = arith.constant 0 : index
    %c0_2 = arith.constant 0 : index
    %1 = vector.load %arg2[%c0_1, %c0_2] : memref<3x16xf32, #tpu.memory_space<vmem>>, vector<3x16xf32>
    %c0_3 = arith.constant 0 : index
    %c0_4 = arith.constant 0 : index
    %2 = vector.load %arg3[%c0_3, %c0_4] : memref<1x16xf32, #tpu.memory_space<vmem>>, vector<1x16xf32>
    %3 = vector.extract_strided_slice %0 {offsets = [0, 0], sizes = [2, 1], strides = [1, 1]} : vector<2x3xf32> to vector<2x1xf32>
    %4 = vector.extract_strided_slice %1 {offsets = [0, 0], sizes = [1, 16], strides = [1, 1]} : vector<3x16xf32> to vector<1x16xf32>
    %5 = vector.broadcast %3 : vector<2x1xf32> to vector<2x16xf32>
    %6 = vector.broadcast %4 : vector<1x16xf32> to vector<2x16xf32>
    %7 = arith.mulf %5, %6 : vector<2x16xf32>
    %8 = vector.broadcast %2 : vector<1x16xf32> to vector<2x16xf32>
    %9 = arith.addf %8, %7 : vector<2x16xf32>
    %10 = vector.extract_strided_slice %0 {offsets = [0, 1], sizes = [2, 1], strides = [1, 1]} : vector<2x3xf32> to vector<2x1xf32>
    %11 = vector.extract_strided_slice %1 {offsets = [1, 0], sizes = [1, 16], strides = [1, 1]} : vector<3x16xf32> to vector<1x16xf32>
    %12 = vector.broadcast %10 : vector<2x1xf32> to vector<2x16xf32>
    %13 = vector.broadcast %11 : vector<1x16xf32> to vector<2x16xf32>
    %14 = arith.mulf %12, %13 : vector<2x16xf32>
    %15 = arith.addf %9, %14 : vector<2x16xf32>
    %16 = vector.extract_strided_slice %0 {offsets = [0, 2], sizes = [2, 1], strides = [1, 1]} : vector<2x3xf32> to vector<2x1xf32>
    %17 = vector.extract_strided_slice %1 {offsets = [2, 0], sizes = [1, 16], strides = [1, 1]} : vector<3x16xf32> to vector<1x16xf32>
    %18 = vector.broadcast %16 : vector<2x1xf32> to vector<2x16xf32>
    %19 = vector.broadcast %17 : vector<1x16xf32> to vector<2x16xf32>
    %20 = arith.mulf %18, %19 : vector<2x16xf32>
    %21 = arith.addf %15, %20 : vector<2x16xf32>
    %cst = arith.constant 0.000000e+00 : f32
    %22 = vector.broadcast %cst : f32 to vector<2x16xf32>
    %23 = arith.maximumf %21, %22 : vector<2x16xf32>
    %c0_5 = arith.constant 0 : index
    %c0_6 = arith.constant 0 : index
    %24 = vector.load %arg4[%c0_5, %c0_6] : memref<2x16xf32, #tpu.memory_space<vmem>>, vector<2x16xf32>
    tpu.vector_store %arg4[%c0_5, %c0_6], %23 {strides = array<i32>} : memref<2x16xf32, #tpu.memory_space<vmem>>, vector<2x16xf32>,
    return
  }
  func.func @transform_0(%arg0: i32) -> (i32, i32) {
    %c0_i32 = arith.constant 0 : i32
    %c0_i32_0 = arith.constant 0 : i32
    return %arg0, %c0_i32 : i32, i32
  }
  func.func @transform_1(%arg0: i32) -> (i32, i32) {
    %c0_i32 = arith.constant 0 : i32
    %c0_i32_0 = arith.constant 0 : i32
    %c0_i32_1 = arith.constant 0 : i32
    return %c0_i32, %c0_i32_0 : i32, i32
  }
  func.func @transform_2(%arg0: i32) -> (i32, i32) {
    %c0_i32 = arith.constant 0 : i32
    %c0_i32_0 = arith.constant 0 : i32
    %c0_i32_1 = arith.constant 0 : i32
    return %c0_i32, %c0_i32_0 : i32, i32
  }
  func.func @transform_3(%arg0: i32) -> (i32, i32) {
    %c0_i32 = arith.constant 0 : i32
    %c0_i32_0 = arith.constant 0 : i32
    return %arg0, %c0_i32 : i32, i32
  }
}

</mosaic_0001>

<bundles_post_ra>
// kernel: simplenet_forward.1
= control target key start
LH: loop header
LB: loop body
LE: loop exit
PB: predicated region body
PF: predicated region fallthrough
CT: control target
= control target key end

     0   :  { %8 = vsyncpa [#allocation3], 0  ;;  %s246_s0 = inlined_call_operand.hbm [shape: f32[2,3], index: 0, kind: input, shape index: {}]   ;;  %s247_s1 = inlined_call_operand.hbm [shape: f32[3,16], index: 1, kind: input, shape index: {}]   ;;  %s248_s2 = inlined_call_operand.vmem [shape: f32[1,16], index: 2, kind: input, shape index: {}]   ;;  %s249_s3 = inlined_call_operand.hbm [shape: f32[2,16], index: 3, kind: output, shape index: {}]  }
   0x1   :  { %9 = vsyncpa [#allocation6], 0 }
   0x2   :  { %10 = vsyncpa [#allocation4], 0  ;;  %s181_s12 = smov [#allocation2]   ;;  %s182_s14 = smov [#allocation5]  }
   0x3   :  { %s17_s13 = sshll.u32 %s181_s12, 4  ;;  %s27_s15 = sshll.u32 %s182_s14, 4  ;;  %s18_s13 = int_to_ptr.vmem [resolvable:$true] %s17_s13  ;;  %s28_s15 = int_to_ptr.vmem [resolvable:$true] %s27_s15 }
   0x4   :  { %s109_s18 = scalar_lea.hbm %s246_s0, 32 }
   0x5   :  { %p110_p0 = scmp.ne.s32.totalorder %s246_s0, %s109_s18  ;;  %p113_p1 = scmp.lt.u32.totalorder %s109_s18, %s246_s0 }
   0x7   :  { %p115_p2 = pnand %p113_p1, %p110_p0 }
   0x9   :  { %118 = shalt.err (!%p115_p2)
}
   0xa   :  { %s119_s23 = scalar_lea.vmem %s18_s13, 32  ;;  %p124_p4 = scmp.lt.s32.totalorder %s18_s13, %s18_s13 }
   0xb   :  { %p120_p3 = scmp.ne.s32.totalorder %s18_s13, %s119_s23  ;;  %p125_p5 = scmp.lt.s32.totalorder %s119_s23, %s119_s23 }
   0xd   :  { %p126_p6 = por %p125_p5, %p124_p4 }
   0xf   :  { %p127_p7 = pnand %p126_p6, %p120_p3 }
  0x11   :  { %130 = shalt.err (!%p127_p7)
}
  0x12   :  { %20 = dma.hbm_to_vmem [thread:$0]  %s246_s0, 32, %s18_s13, [#allocation3]  }
  0x13   :  { %s131_s28 = scalar_lea.hbm %s247_s1, 64 }
  0x14   :  { %p132_p8 = scmp.ne.s32.totalorder %s247_s1, %s131_s28  ;;  %p135_p9 = scmp.lt.u32.totalorder %s131_s28, %s247_s1 }
  0x16   :  { %p137_p10 = pnand %p135_p9, %p132_p8 }
  0x18   :  { %140 = shalt.err (!%p137_p10)
}
  0x19   :  { %s141_s6 = scalar_lea.vmem %s28_s15, 64  ;;  %p146_p12 = scmp.lt.s32.totalorder %s28_s15, %s28_s15 }
  0x1a   :  { %p142_p11 = scmp.ne.s32.totalorder %s28_s15, %s141_s6  ;;  %p147_p13 = scmp.lt.s32.totalorder %s141_s6, %s141_s6 }
  0x1c   :  { %p148_p0 = por %p147_p13, %p146_p12 }
  0x1e   :  { %p149_p1 = pnand %p148_p0, %p142_p11 }
  0x20   :  { %152 = shalt.err (!%p149_p1)
}
  0x21   :  { %30 = dma.hbm_to_vmem [thread:$0]  %s247_s1, 64, %s28_s15, [#allocation6]  }
  0x22   :  { %175 = dma.done.wait [#allocation3], 32  }
  0x23   :  { %176 = vsyncadd [#allocation3], 4294967264 }
  0x24   :  { %177 = dma.done.wait [#allocation6], 64  }
  0x25   :  { %178 = vsyncadd [#allocation6], 4294967232  ;;  %v183_v0 = vmov 0   ;;  %v184_v1 = vmov 2   ;;  %v39_v2 = vld [vmem:[#allocation2] sm:$0x3]  ;;  %v47_v4 = vlaneseq }
  0x26   :  { %105 = vset.pattern.permute.xlu0 %v183_v0  ;;  %107 = vset.pattern.permute.xlu1 %v184_v1  ;;  %v185_v3 = vmov 1   ;;  %v40_v7 = vld [vmem:[#allocation5] sm:$0x7]  ;;  %v98_v15 = vld [vmem:[%s248_s2] ss:$0 sm:$0xff]  ;;  %s186_s9 = smov [#allocation7]  }
  0x27   :  { %44 = vperm.xlu0 %105, %v39_v2   ;;  %70 = vperm.xlu1 %107, %v39_v2   ;;  %v48_v5 = vshrl.u32 %v47_v4, 7  ;;  %s88_s10 = sshll.u32 %s186_s9, 4  ;;  %vm80_vm0 = vcmask 123904   ;;  %s89_s10 = int_to_ptr.vmem [resolvable:$true] %s88_s10 }
  0x28   :  { %s153_s11 = scalar_lea.vmem %s89_s10, 32  ;;  %p158_p3 = scmp.lt.s32.totalorder %s89_s10, %s89_s10 }
  0x29   :  { %v49_v6 = vsub.s32 0, %v48_v5  ;;  %v65_v9 = vsub.s32 1, %v48_v5  ;;  %v75_v10 = vsub.s32 2, %v48_v5  ;;  %p154_p2 = scmp.ne.s32.totalorder %s89_s10, %s153_s11  ;;  %p159_p4 = scmp.lt.s32.totalorder %s153_s11, %s153_s11 }
  0x2b   :  { %106 = vset.pattern.permute.xlu0 %v185_v3  ;;  %v50_v8 = vrot.slane %v40_v7, %v49_v6  ;;  %v66_v13 = vrot.slane %v40_v7, %v65_v9  ;;  %v76_v14 = vrot.slane %v40_v7, %v75_v10  ;;  %p160_p5 = por %p159_p4, %p158_p3 }
  0x2c   :  { %60 = vperm.xlu0 %106, %v39_v2  }
  0x2d   :  { %p161_p6 = pnand %p160_p5, %p154_p2 }
  0x30   :  { %108 = vset.pattern.permute.xlu0 %v184_v1 }
  0xa6   :  { %v45_v11 = vpop.permute.xlu0 %44  ;;  %v71_v16 = vpop.permute.xlu1 %70 }
  0xa7   :  { %v51_v12 = vmul.f32 %v50_v8, %v45_v11  ;;  %v77_v20 = vmul.f32 %v76_v14, %v71_v16 }
  0xa9   :  { %v58_v18 = vadd.f32 %v98_v15, %v51_v12 }
  0xab   :  { %v61_v17 = vpop.permute.xlu0 %60 }
  0xac   :  { %v67_v19 = vmul.f32 %v66_v13, %v61_v17 }
  0xae   :  { %v68_v21 = vadd.f32 %v67_v19, %v58_v18 }
  0xb0   :  { %v78_v22 = vadd.f32 %v77_v20, %v68_v21 }
  0xb2   :  { %v79_v23 = vmax.f32 %v78_v22, 0.0 }
  0xb4   :  { %81 = vst.msk [vmem:[#allocation7] sm:$0x3] %vm80_vm0, %v79_v23 }
  0xb5   :  { %164 = shalt.err (!%p161_p6)
}
  0xb6   :  { %s165_s13 = scalar_lea.hbm %s249_s3, 32 }
  0xb7   :  { %p166_p7 = scmp.ne.s32.totalorder %s249_s3, %s165_s13  ;;  %p169_p8 = scmp.lt.u32.totalorder %s165_s13, %s249_s3 }
  0xb9   :  { %p171_p9 = pnand %p169_p8, %p166_p7 }
  0xbb   :  { %174 = shalt.err (!%p171_p9)
}
  0xbc   :  { %91 = dma.vmem_to_hbm [thread:$0]  %s89_s10, 32, %s249_s3, [#allocation4]  }
  0xbd   :  { %179 = dma.done.wait [#allocation4], 32  }
  0xbe   :  { %180 = vsyncadd [#allocation4], 4294967264 }
  0xbf   :  { %95 = vsyncpa [#allocation3], 1 }
  0xc0   :  { %96 = vsyncpa [#allocation6], 1 }
  0xc1   :  { %97 = vsyncpa [#allocation4], 1 }

</bundles_post_ra>
